<compile_context>
chip_gen: v5e
topology: v5e:2x2
jax: 0.10.0
libtpu: 0.0.40
codegen_flags: <defaults>
</compile_context>

<pallas_src>
import functools

import jax
import jax.numpy as jnp
from jax import lax
from jax.experimental import pallas as pl
from jax.experimental.pallas import tpu as pltpu


def _sdpa_kernel(*refs, inv_temperature, mask_mode, return_attn, pack_out,
                 group_heads, d_v, exp_dtype):
    # Ref order: q, k, v, [mask], out, [attn]  (mask/attn presence is static).
    q_ref, k_ref, v_ref = refs[0], refs[1], refs[2]
    idx = 3
    mask_ref = None
    if mask_mode != "none":
        mask_ref = refs[idx]
        idx += 1
    out_ref = refs[idx]
    idx += 1
    attn_ref = refs[idx] if return_attn else None

    q = q_ref[0]          # (G, tq, Dk) in the input dtype (bf16-ready for the MXU)
    k = k_ref[0]          # (G, Lk, Dk)
    v = v_ref[0]          # (G, Lk, Dv)

    # scores[g, i, j] = sum_d q[g, i, d] * k[g, j, d]  (batched over heads, f32 MXU accum).
    scores = lax.dot_general(
        q, k,
        dimension_numbers=(((2,), (2,)), ((0,), (0,))),
        preferred_element_type=jnp.float32,
    )
    # Scale AFTER the matmul, in f32 (avoids rounding q/temperature to bf16 pre-MXU).
    scores = scores * jnp.float32(inv_temperature)

    if mask_mode == "keep":
        # int8 0/1 keep-mask block (1, tq, Lk): masked positions get -1e9 added,
        # exactly like the PyTorch forward's (1 - mask) * -1e9.
        keep = mask_ref[0] != 0
        scores = jnp.where(keep, scores, scores - 1e9)
    elif mask_mode == "additive":
        scores = scores + mask_ref[0].astype(jnp.float32)   # (MG,tq,Lk) broadcasts over heads

    # Numerically stable softmax over Lk. exp may run in bf16 on bf16 models (bf16 EUP on
    # v6e/v7x); max/sum/normalization stay in f32. Normalization uses an exact reciprocal
    # on the (G, tq, 1) denominator only.
    m = jnp.max(scores, axis=-1, keepdims=True)
    p = jnp.exp((scores - m).astype(exp_dtype)).astype(jnp.float32)
    denom = jnp.sum(p, axis=-1, keepdims=True)
    attn = p * (1.0 / denom)

    # output = dropout(attn) @ v ; dropout(p=0.1) is identity in eval mode.
    # TODO(synk): training-mode dropout (pltpu.prng_random_bits mask + 1/(1-p) scale).
    out = lax.dot_general(
        attn.astype(v.dtype), v,
        dimension_numbers=(((2,), (1,)), ((0,), (0,))),
        preferred_element_type=jnp.float32,
    )

    if pack_out:
        # Lane-dense output: block is (1, 1, tq, G*Dv); each head goes to its lane range so
        # the HBM writeback is one dense (tq, G*Dv) slab instead of Dv<128 partial stores.
        for g in range(group_heads):                 # static loop, G is small
            out_ref[0, 0, :, g * d_v:(g + 1) * d_v] = out[g].astype(out_ref.dtype)
    else:
        out_ref[0] = out.astype(out_ref.dtype)

    if attn_ref is not None:
        attn_ref[0] = attn.astype(attn_ref.dtype)


def _vmem_capacity_bytes():
    try:
        cap = int(getattr(pltpu.get_tpu_info(), "vmem_capacity_bytes", 0))
        if cap > 0:
            return cap
    except Exception:
        pass
    return 64 * 1024 * 1024          # conservative fallback (v7x per-TensorCore VMEM)


def _sublane_multiple(dtype):
    return {4: 8, 2: 16, 1: 32}.get(jnp.dtype(dtype).itemsize, 8)


def _choose_q_tile(Lq, sublane, max_tile):
    if Lq <= max_tile:
        return Lq                                    # full-extent block is always legal
    top = (max_tile // sublane) * sublane
    for t in range(top, sublane - 1, -sublane):
        if Lq % t == 0:
            return t
    return top                                       # non-divisible Lq: cdiv grid, tail rows discarded


def _choose_head_group(H, B, per_head_bytes, budget_bytes):
    divisors = [g for g in range(1, H + 1) if H % g == 0]
    fitting = [g for g in divisors if g * per_head_bytes <= budget_bytes]
    if not fitting:
        return 1
    # Keep >=2 steps on the leading "parallel" axes so v7x's 2 TensorCores both get
    # distinct (batch, head-group) work instead of re-streaming the same K/V blocks.
    preferred = [g for g in fitting if B * (H // g) >= 2]
    return max(preferred) if preferred else max(fitting)


def scaled_dot_product_attention(q, k, v, temperature, mask=None, return_attn=True):
    """q:[B,H,Lq,Dk] k:[B,H,Lk,Dk] v:[B,H,Lk,Dv].
    mask: None | [B,Lq,Lk] 0/1 keep-mask | [B or 1, 1 or H, Lq, Lk] additive mask.
    Returns (output [B,H,Lq,Dv], attn [B,H,Lq,Lk] or None)."""
    B, H, Lq, Dk = q.shape
    Lk = k.shape[2]
    Dv = v.shape[3]

    in_itemsize = jnp.dtype(q.dtype).itemsize
    attn_itemsize = in_itemsize                      # returned attn uses the input dtype

    # ---- mask preprocessing: narrow dtype, no head broadcast in HBM ----
    if mask is None:
        mask_mode, mask_arr, mask_itemsize, Bm, Hm = "none", None, 0, 1, 1
    elif mask.ndim == 3:
        # 0/1 keep-mask (as the PyTorch forward expects): streamed as int8 (4x less HBM
        # traffic than f32); the additive -1e9 term is rebuilt in-kernel on the VPU.
        mask_mode = "keep"
        mask_arr = (mask != 0).astype(jnp.int8)[:, None, :, :]     # [B, 1, Lq, Lk]
        mask_itemsize, Bm, Hm = 1, B, 1
    elif mask.ndim == 4:
        # Already-additive mask, used as-is (matches the PyTorch forward). Pass bf16 to
        # halve mask HBM traffic when bias exactness is not critical.
        mask_mode = "additive"
        mask_arr = mask
        mask_itemsize = jnp.dtype(mask.dtype).itemsize
        Bm, Hm = mask.shape[0], mask.shape[1]
        if Bm not in (1, B) or Hm not in (1, H):
            raise ValueError("4-D mask batch/head dims must be 1 or match q")
    else:
        raise ValueError("mask must be None, 3-D or 4-D")

    # ---- generation-aware tiling (v5e/v6e: 128 MiB VMEM, v7x: 64 MiB per TensorCore) ----
    capacity = _vmem_capacity_bytes()
    budget = int(0.60 * capacity)                    # per-step working-set budget
    max_tile = 512 if capacity >= 96 * 1024 * 1024 else (
        256 if capacity >= 48 * 1024 * 1024 else 128)
    sublane = _sublane_multiple(q.dtype)
    mask_per_head = (mask_mode == "additive" and Hm == H)

    def per_head_bytes(tq):
        b = 2 * (tq * Dk + Lk * Dk + Lk * Dv) * in_itemsize   # q/k/v blocks (double-buffered)
        b += 2 * tq * Dv * in_itemsize                        # out block
        if return_attn:
            b += 2 * tq * Lk * attn_itemsize                  # attn output block
        b += 3 * tq * Lk * 4                                  # scores / exp / attn f32 temporaries
        if mask_per_head:
            b += 2 * tq * Lk * mask_itemsize                  # per-head mask block
        return b

    def fixed_bytes(tq):                                      # head-shared mask block
        if mask_mode == "none" or mask_per_head:
            return 0
        return 2 * tq * Lk * mask_itemsize

    tq = _choose_q_tile(Lq, sublane, max_tile)
    while tq > sublane and tq % sublane == 0 and per_head_bytes(tq) + fixed_bytes(tq) > budget:
        tq = max(sublane, (tq // 2 // sublane) * sublane)     # shrink q tile before giving up on G

    G = _choose_head_group(H, B, per_head_bytes(tq), budget - fixed_bytes(tq))
    MG = G if mask_per_head else 1

    step_bytes = G * per_head_bytes(tq) + fixed_bytes(tq)
    vmem_limit = int(min(0.70 * capacity, max(2.0 * step_bytes, 32 * 1024 * 1024)))
    vmem_limit = max(vmem_limit, int(1.2 * step_bytes))

    # Lane-dense packed output when the per-head Dv is narrower than a vreg's 128 lanes.
    pack_out = (G > 1) and (Dv % 128 != 0) and (Dv % 8 == 0) and ((G * Dv) % 128 == 0)

    grid = (B, H // G, pl.cdiv(Lq, tq))

    def q_map(b, h, qi):
        return (b, h, qi, 0)

    def kv_map(b, h, qi):
        return (b, h, 0, 0)

    def mask_map(b, h, qi):
        return (b if Bm > 1 else 0, h if Hm > 1 else 0, qi, 0)

    in_specs = [
        pl.BlockSpec((1, G, tq, Dk), q_map),
        pl.BlockSpec((1, G, Lk, Dk), kv_map),
        pl.BlockSpec((1, G, Lk, Dv), kv_map),
    ]
    inputs = [q, k, v]
    if mask_mode != "none":
        in_specs.append(pl.BlockSpec((1, MG, tq, Lk), mask_map))
        inputs.append(mask_arr)

    if pack_out:
        out_struct = jax.ShapeDtypeStruct((B, H // G, Lq, G * Dv), q.dtype)
        out_spec = pl.BlockSpec((1, 1, tq, G * Dv), q_map)
    else:
        out_struct = jax.ShapeDtypeStruct((B, H, Lq, Dv), q.dtype)
        out_spec = pl.BlockSpec((1, G, tq, Dv), q_map)

    if return_attn:
        out_shape = (out_struct, jax.ShapeDtypeStruct((B, H, Lq, Lk), q.dtype))
        out_specs = (out_spec, pl.BlockSpec((1, G, tq, Lk), q_map))
    else:
        out_shape = out_struct
        out_specs = out_spec

    flops = 2 * B * H * Lq * Lk * (Dk + Dv)
    mask_stream_bytes = 0
    if mask_mode != "none":
        mask_stream_bytes = int(mask_arr.size) * mask_itemsize * (H // G if Hm == 1 else 1)
    bytes_accessed = int(
        (q.size + k.size + v.size + B * H * Lq * Dv) * in_itemsize
        + mask_stream_bytes
        + (B * H * Lq * Lk * attn_itemsize if return_attn else 0)
    )

    # bf16 exp targets the bf16 EUP on v6e/v7x; f32 models keep f32 math (v5e-safe).
    exp_dtype = jnp.bfloat16 if q.dtype == jnp.bfloat16 else jnp.float32

    kernel = functools.partial(
        _sdpa_kernel,
        inv_temperature=1.0 / float(temperature),
        mask_mode=mask_mode,
        return_attn=return_attn,
        pack_out=pack_out,
        group_heads=G,
        d_v=Dv,
        exp_dtype=exp_dtype,
    )

    result = pl.pallas_call(
        kernel,
        out_shape=out_shape,
        grid_spec=pltpu.PrefetchScalarGridSpec(
            num_scalar_prefetch=0,
            grid=grid,
            in_specs=in_specs,
            out_specs=out_specs,
        ),
        compiler_params=pltpu.CompilerParams(
            # No reduction axis (Lk is resident per step) -> all axes parallel, so v7x
            # can shard (batch, head-group, q-tile) across its two TensorCores.
            dimension_semantics=("parallel", "parallel", "parallel"),
            vmem_limit_bytes=vmem_limit,
        ),
        cost_estimate=pl.CostEstimate(
            flops=flops,
            transcendentals=B * H * Lq * Lk,
            bytes_accessed=bytes_accessed,
        ),
    )(*inputs)

    if return_attn:
        out, attn = result
    else:
        out, attn = result, None

    if pack_out:
        # Restore [B, H, Lq, Dv] from the lane-dense [B, H/G, Lq, G*Dv] kernel layout.
        out = (out.reshape(B, H // G, Lq, G, Dv)
                  .transpose(0, 1, 3, 2, 4)
                  .reshape(B, H, Lq, Dv))
    return out, attn


def _reference(q, k, v, temperature, mask=None):
    # Pure-f32 reference without matmuls (independent of the MXU's default f32 precision).
    scores = jnp.sum(q[:, :, :, None, :] * k[:, :, None, :, :], axis=-1) / temperature
    if mask is not None and mask.ndim == 3:
        add = (1.0 - mask.astype(jnp.float32)) * -1e9
        scores = scores + add[:, None, :, :]
    elif mask is not None:
        scores = scores + mask
    attn = jax.nn.softmax(scores, axis=-1)
    out = jnp.sum(attn[..., None] * v[:, :, None, :, :], axis=-2)
    return out, attn


if __name__ == "__main__":
    key = jax.random.PRNGKey(0)
    B, H, Lq, Lk, Dk, Dv = 2, 4, 8, 8, 32, 32
    temperature = float(Dk) ** 0.5

    kq, kk, kv, km = jax.random.split(key, 4)

    # Inputs quantized to bf16-representable values so the comparison is insensitive to
    # the MXU's default (bf16-pass) precision for f32 matmul operands.
    def _bf16_exact(rng, shape):
        return jax.random.normal(rng, shape, dtype=jnp.float32).astype(jnp.bfloat16).astype(jnp.float32)

    q = _bf16_exact(kq, (B, H, Lq, Dk))
    k = _bf16_exact(kk, (B, H, Lk, Dk))
    v = _bf16_exact(kv, (B, H, Lk, Dv))
    # 3-D 0/1 keep-mask [B, Lq, Lk], as the PyTorch forward expects.
    mask = (jax.random.uniform(km, (B, Lq, Lk)) > 0.2).astype(jnp.float32)

    out, attn = scaled_dot_product_attention(q, k, v, temperature, mask)
    jax.block_until_ready((out, attn))

    ref_out, ref_attn = _reference(q, k, v, temperature, mask)
    assert out.shape == (B, H, Lq, Dv) and attn.shape == (B, H, Lq, Lk)
    # Tolerance covers MXU default-precision rounding of the f32 attention weights in the
    # second matmul; structural errors would be O(1).
    assert jnp.allclose(out, ref_out, atol=1e-2, rtol=1e-2), "output mismatch"
    assert jnp.allclose(attn, ref_attn, atol=1e-2, rtol=1e-2), "attn mismatch"

    print("KERNEL_OK")
</pallas_src>

<mosaic_0001>
module attributes {stable_mosaic.version = 11 : i64} {
  func.func @_sdpa_kernel(%arg0: i32, %arg1: i32, %arg2: i32, %arg3: memref<1x4x8x32xf32, #tpu.memory_space<vmem>>, %arg4: memref<1x4x8x32xf32, #tpu.memory_space<vmem>>, %arg5: memref<1x4x8x32xf32, #tpu.memory_space<vmem>>, %arg6: memref<1x1x8x8xi8, #tpu.memory_space<vmem>>, %arg7: memref<1x1x8x128xf32, #tpu.memory_space<vmem>>, %arg8: memref<1x4x8x8xf32, #tpu.memory_space<vmem>>) attributes {dimension_semantics = [#tpu.dimension_semantics<parallel>, #tpu.dimension_semantics<parallel>, #tpu.dimension_semantics<parallel>], iteration_bounds = array<i64: 2, 1, 1>, scalar_prefetch = 0 : i64, scratch_operands = 0 : i64, tpu.core_type = #tpu.core_type<tc>, window_params = [{transform_indices = @transform_0, window_bounds = array<i64: 1, 4, 8, 32>}, {transform_indices = @transform_1, window_bounds = array<i64: 1, 4, 8, 32>}, {transform_indices = @transform_2, window_bounds = array<i64: 1, 4, 8, 32>}, {transform_indices = @transform_3, window_bounds = array<i64: 1, 1, 8, 8>}, {transform_indices = @transform_4, window_bounds = array<i64: 1, 1, 8, 128>}, {transform_indices = @transform_5, window_bounds = array<i64: 1, 4, 8, 8>}]} {
    %c0 = arith.constant 0 : index
    %c0_0 = arith.constant 0 : index
    %c0_1 = arith.constant 0 : index
    %c0_2 = arith.constant 0 : index
    %0 = vector.load %arg3[%c0, %c0_0, %c0_1, %c0_2] : memref<1x4x8x32xf32, #tpu.memory_space<vmem>>, vector<1x4x8x32xf32>
    %1 = vector.shape_cast %0 : vector<1x4x8x32xf32> to vector<4x8x32xf32>
    %c0_3 = arith.constant 0 : index
    %c0_4 = arith.constant 0 : index
    %c0_5 = arith.constant 0 : index
    %c0_6 = arith.constant 0 : index
    %2 = vector.load %arg4[%c0_3, %c0_4, %c0_5, %c0_6] : memref<1x4x8x32xf32, #tpu.memory_space<vmem>>, vector<1x4x8x32xf32>
    %3 = vector.shape_cast %2 : vector<1x4x8x32xf32> to vector<4x8x32xf32>
    %c0_7 = arith.constant 0 : index
    %c0_8 = arith.constant 0 : index
    %c0_9 = arith.constant 0 : index
    %c0_10 = arith.constant 0 : index
    %4 = vector.load %arg5[%c0_7, %c0_8, %c0_9, %c0_10] : memref<1x4x8x32xf32, #tpu.memory_space<vmem>>, vector<1x4x8x32xf32>
    %5 = vector.shape_cast %4 : vector<1x4x8x32xf32> to vector<4x8x32xf32>
    %cst = arith.constant dense<0.000000e+00> : vector<4x8x8xf32>
    %6 = tpu.matmul %1, %3, %cst {dimension_numbers = #tpu.dot_dimension_numbers<[2], [2], [1], [1], [0, 0, 0, 1, 1, 1], [0], [0]>} : vector<4x8x32xf32>, vector<4x8x32xf32>, vector<4x8x8xf32> -> vector<4x8x8xf32>
    %cst_11 = arith.constant 0.176776692 : f32
    %7 = vector.broadcast %cst_11 : f32 to vector<4x8x8xf32>
    %8 = arith.mulf %6, %7 : vector<4x8x8xf32>
    %c0_12 = arith.constant 0 : index
    %c0_13 = arith.constant 0 : index
    %c0_14 = arith.constant 0 : index
    %c0_15 = arith.constant 0 : index
    %9 = vector.load %arg6[%c0_12, %c0_13, %c0_14, %c0_15] : memref<1x1x8x8xi8, #tpu.memory_space<vmem>>, vector<1x1x8x8xi8>
    %10 = vector.shape_cast %9 : vector<1x1x8x8xi8> to vector<1x8x8xi8>
    %c0_i8 = arith.constant 0 : i8
    %11 = vector.broadcast %c0_i8 : i8 to vector<1x8x8xi8>
    %12 = arith.cmpi ne, %10, %11 : vector<1x8x8xi8>
    %cst_16 = arith.constant 1.000000e+09 : f32
    %13 = vector.broadcast %cst_16 : f32 to vector<4x8x8xf32>
    %14 = arith.subf %8, %13 : vector<4x8x8xf32>
    %15 = vector.shape_cast %12 : vector<1x8x8xi1> to vector<1x8x8xi1>
    %16 = vector.broadcast %15 : vector<1x8x8xi1> to vector<4x8x8xi1>
    %17 = arith.select %16, %8, %14 : vector<4x8x8xi1>, vector<4x8x8xf32>
    %cst_17 = arith.constant dense<0xFF800000> : vector<4x8xf32>
    %18 = vector.multi_reduction <maximumf>, %17, %cst_17 [2] : vector<4x8x8xf32> to vector<4x8xf32>
    %19 = vector.shape_cast %18 : vector<4x8xf32> to vector<4x8x1xf32>
    %20 = vector.broadcast %19 : vector<4x8x1xf32> to vector<4x8x8xf32>
    %21 = arith.subf %17, %20 : vector<4x8x8xf32>
    %22 = math.exp %21 : vector<4x8x8xf32>
    %cst_18 = arith.constant dense<0.000000e+00> : vector<4x8xf32>
    %23 = vector.multi_reduction <add>, %22, %cst_18 [2] : vector<4x8x8xf32> to vector<4x8xf32>
    %24 = vector.shape_cast %23 : vector<4x8xf32> to vector<4x8x1xf32>
    %cst_19 = arith.constant 1.000000e+00 : f32
    %25 = vector.broadcast %cst_19 : f32 to vector<4x8x1xf32>
    %26 = arith.divf %25, %24 : vector<4x8x1xf32>
    %27 = vector.broadcast %26 : vector<4x8x1xf32> to vector<4x8x8xf32>
    %28 = arith.mulf %22, %27 : vector<4x8x8xf32>
    %cst_20 = arith.constant dense<0.000000e+00> : vector<4x8x32xf32>
    %29 = tpu.matmul %28, %5, %cst_20 {dimension_numbers = #tpu.dot_dimension_numbers<[2], [1], [1], [2], [0, 0, 0, 1, 1, 2], [0], [0]>} : vector<4x8x8xf32>, vector<4x8x32xf32>, vector<4x8x32xf32> -> vector<4x8x32xf32>
    %30 = vector.extract_strided_slice %29 {offsets = [0, 0, 0], sizes = [1, 8, 32], strides = [1, 1, 1]} : vector<4x8x32xf32> to vector<1x8x32xf32>
    %31 = vector.shape_cast %30 : vector<1x8x32xf32> to vector<8x32xf32>
    %c0_21 = arith.constant 0 : index
    %c0_22 = arith.constant 0 : index
    %c0_23 = arith.constant 0 : index
    %c0_24 = arith.constant 0 : index
    %32 = vector.load %arg7[%c0_21, %c0_22, %c0_23, %c0_24] : memref<1x1x8x128xf32, #tpu.memory_space<vmem>>, vector<1x1x8x32xf32>
    %33 = vector.shape_cast %32 : vector<1x1x8x32xf32> to vector<8x32xf32>
    %34 = vector.shape_cast %31 : vector<8x32xf32> to vector<1x1x8x32xf32>
    tpu.vector_store %arg7[%c0_21, %c0_22, %c0_23, %c0_24], %34 {strides = array<i32>} : memref<1x1x8x128xf32, #tpu.memory_space<vmem>>, vector<1x1x8x32xf32>,
    %35 = vector.extract_strided_slice %29 {offsets = [1, 0, 0], sizes = [1, 8, 32], strides = [1, 1, 1]} : vector<4x8x32xf32> to vector<1x8x32xf32>
    %36 = vector.shape_cast %35 : vector<1x8x32xf32> to vector<8x32xf32>
    %c0_25 = arith.constant 0 : index
    %c0_26 = arith.constant 0 : index
    %c0_27 = arith.constant 0 : index
    %c32 = arith.constant 32 : index
    %37 = vector.load %arg7[%c0_25, %c0_26, %c0_27, %c32] : memref<1x1x8x128xf32, #tpu.memory_space<vmem>>, vector<1x1x8x32xf32>
    %38 = vector.shape_cast %37 : vector<1x1x8x32xf32> to vector<8x32xf32>
    %39 = vector.shape_cast %36 : vector<8x32xf32> to vector<1x1x8x32xf32>
    tpu.vector_store %arg7[%c0_25, %c0_26, %c0_27, %c32], %39 {strides = array<i32>} : memref<1x1x8x128xf32, #tpu.memory_space<vmem>>, vector<1x1x8x32xf32>,
    %40 = vector.extract_strided_slice %29 {offsets = [2, 0, 0], sizes = [1, 8, 32], strides = [1, 1, 1]} : vector<4x8x32xf32> to vector<1x8x32xf32>
    %41 = vector.shape_cast %40 : vector<1x8x32xf32> to vector<8x32xf32>
    %c0_28 = arith.constant 0 : index
    %c0_29 = arith.constant 0 : index
    %c0_30 = arith.constant 0 : index
    %c64 = arith.constant 64 : index
    %42 = vector.load %arg7[%c0_28, %c0_29, %c0_30, %c64] : memref<1x1x8x128xf32, #tpu.memory_space<vmem>>, vector<1x1x8x32xf32>
    %43 = vector.shape_cast %42 : vector<1x1x8x32xf32> to vector<8x32xf32>
    %44 = vector.shape_cast %41 : vector<8x32xf32> to vector<1x1x8x32xf32>
    tpu.vector_store %arg7[%c0_28, %c0_29, %c0_30, %c64], %44 {strides = array<i32>} : memref<1x1x8x128xf32, #tpu.memory_space<vmem>>, vector<1x1x8x32xf32>,
    %45 = vector.extract_strided_slice %29 {offsets = [3, 0, 0], sizes = [1, 8, 32], strides = [1, 1, 1]} : vector<4x8x32xf32> to vector<1x8x32xf32>
    %46 = vector.shape_cast %45 : vector<1x8x32xf32> to vector<8x32xf32>
    %c0_31 = arith.constant 0 : index
    %c0_32 = arith.constant 0 : index
    %c0_33 = arith.constant 0 : index
    %c96 = arith.constant 96 : index
    %47 = vector.load %arg7[%c0_31, %c0_32, %c0_33, %c96] : memref<1x1x8x128xf32, #tpu.memory_space<vmem>>, vector<1x1x8x32xf32>
    %48 = vector.shape_cast %47 : vector<1x1x8x32xf32> to vector<8x32xf32>
    %49 = vector.shape_cast %46 : vector<8x32xf32> to vector<1x1x8x32xf32>
    tpu.vector_store %arg7[%c0_31, %c0_32, %c0_33, %c96], %49 {strides = array<i32>} : memref<1x1x8x128xf32, #tpu.memory_space<vmem>>, vector<1x1x8x32xf32>,
    %c0_34 = arith.constant 0 : index
    %c0_35 = arith.constant 0 : index
    %c0_36 = arith.constant 0 : index
    %c0_37 = arith.constant 0 : index
    %50 = vector.load %arg8[%c0_34, %c0_35, %c0_36, %c0_37] : memref<1x4x8x8xf32, #tpu.memory_space<vmem>>, vector<1x4x8x8xf32>
    %51 = vector.shape_cast %50 : vector<1x4x8x8xf32> to vector<4x8x8xf32>
    %52 = vector.shape_cast %28 : vector<4x8x8xf32> to vector<1x4x8x8xf32>
    tpu.vector_store %arg8[%c0_34, %c0_35, %c0_36, %c0_37], %52 {strides = array<i32>} : memref<1x4x8x8xf32, #tpu.memory_space<vmem>>, vector<1x4x8x8xf32>,
    return
  }
  func.func @transform_0(%arg0: i32, %arg1: i32, %arg2: i32) -> (i32, i32, i32, i32) {
    %c0_i32 = arith.constant 0 : i32
    %c0_i32_0 = arith.constant 0 : i32
    return %arg0, %arg1, %arg2, %c0_i32 : i32, i32, i32, i32
  }
  func.func @transform_1(%arg0: i32, %arg1: i32, %arg2: i32) -> (i32, i32, i32, i32) {
    %c0_i32 = arith.constant 0 : i32
    %c0_i32_0 = arith.constant 0 : i32
    %c0_i32_1 = arith.constant 0 : i32
    return %arg0, %arg1, %c0_i32, %c0_i32_0 : i32, i32, i32, i32
  }
  func.func @transform_2(%arg0: i32, %arg1: i32, %arg2: i32) -> (i32, i32, i32, i32) {
    %c0_i32 = arith.constant 0 : i32
    %c0_i32_0 = arith.constant 0 : i32
    %c0_i32_1 = arith.constant 0 : i32
    return %arg0, %arg1, %c0_i32, %c0_i32_0 : i32, i32, i32, i32
  }
  func.func @transform_3(%arg0: i32, %arg1: i32, %arg2: i32) -> (i32, i32, i32, i32) {
    %c0_i32 = arith.constant 0 : i32
    %c0_i32_0 = arith.constant 0 : i32
    %c0_i32_1 = arith.constant 0 : i32
    return %arg0, %c0_i32, %arg2, %c0_i32_0 : i32, i32, i32, i32
  }
  func.func @transform_4(%arg0: i32, %arg1: i32, %arg2: i32) -> (i32, i32, i32, i32) {
    %c0_i32 = arith.constant 0 : i32
    %c0_i32_0 = arith.constant 0 : i32
    return %arg0, %arg1, %arg2, %c0_i32 : i32, i32, i32, i32
  }
  func.func @transform_5(%arg0: i32, %arg1: i32, %arg2: i32) -> (i32, i32, i32, i32) {
    %c0_i32 = arith.constant 0 : i32
    %c0_i32_0 = arith.constant 0 : i32
    return %arg0, %arg1, %arg2, %c0_i32 : i32, i32, i32, i32
  }
}

</mosaic_0001>

<bundles_post_ra>
// kernel: tpu_custom_call.1
= control target key start
LH: loop header
LB: loop body
LE: loop exit
PB: predicated region body
PF: predicated region fallthrough
CT: control target
= control target key end

     0   :  { %s1722_s0 = inlined_call_operand.hbm [shape: f32[2,4,8,32], index: 0, kind: input, shape index: {}]   ;;  %s1723_s1 = inlined_call_operand.hbm [shape: f32[2,4,8,32], index: 1, kind: input, shape index: {}]   ;;  %s1724_s2 = inlined_call_operand.hbm [shape: f32[2,4,8,32], index: 2, kind: input, shape index: {}]   ;;  %s1725_s3 = inlined_call_operand.hbm [shape: s8[2,1,8,8], index: 3, kind: input, shape index: {}]   ;;  %s1726_s4 = inlined_call_operand.hbm [shape: f32[2,1,8,128], index: 4, kind: output, shape index: {0}]   ;;  %s1727_s5 = inlined_call_operand.hbm [shape: f32[2,4,8,8], index: 5, kind: output, shape index: {1}]  }
   0x1   :  { %1735 = sst [smem:[#allocation24_spill]] %s1722_s0 }
   0x2   :  { %1736 = sst [smem:[#allocation25_spill]] %s1723_s1 }
   0x3   :  { %1737 = sst [smem:[#allocation26_spill]] %s1726_s4 }
   0x4   :  { %11 = vsyncpa [#allocation3], 0 }
   0x5   :  { %13 = vsyncpa [#allocation3 + $0x1], 0 }
   0x6   :  { %14 = vsyncpa [#allocation6], 0 }
   0x7   :  { %16 = vsyncpa [#allocation6 + $0x1], 0 }
   0x8   :  { %17 = vsyncpa [#allocation9], 0 }
   0x9   :  { %19 = vsyncpa [#allocation9 + $0x1], 0 }
   0xa   :  { %20 = vsyncpa [#allocation4], 0 }
   0xb   :  { %22 = vsyncpa [#allocation4 + $0x1], 0 }
   0xc   :  { %23 = vsyncpa [#allocation12], 0 }
   0xd   :  { %25 = vsyncpa [#allocation12 + $0x1], 0  ;;  %s1456_s18 = smov 0   ;;  %s1458_s19 = smov 0  }
   0xe   :  { %s1460_s20 = smov 0   ;;  %s1462_s21 = smov 0  }
   0xf   :  { %s1464_s22 = smov 0   ;;  %s1466_s23 = smov 0  }
  0x10 LB: > { %1738 = sst [smem:[#allocation18_spill]] %s1396_s18  ;;  %s1487_s24 = sadd.s32 4294967295, %s1416_s23   ;;  %s1416_s23 = sphi %s1466_s23, %s31_s23   ;;  %s1412_s22 = sphi %s1464_s22, %s1764_s22   ;;  %s1408_s21 = sphi %s1462_s21, %s1763_s21   ;;  %s1404_s20 = sphi %s1460_s20, %s1759_s20   ;;  %s1400_s19 = sphi %s1458_s19, %s1762_s19   ;;  %s1396_s18 = sphi %s1456_s18, %s1761_s18  }
  0x11   : > { %1739 = sst [smem:[#allocation19_spill]] %s1404_s20  ;;  %s1020_s25 = sadd.s32 4294967294, %s1416_s23  }
  0x12   : > { %1740 = sst [smem:[#allocation20_spill]] %s1416_s23  ;;  %s50_s26 = sadd.s32 1, %s1412_s22 }
  0x13   : > { %s61_s27 = sadd.s32 1, %s1404_s20  ;;  %p52_p0 = scmp.ge.s32.totalorder %s50_s26, 2 }
  0x14   : > { %p68_p1 = scmp.ne.s32.totalorder %s1404_s20, %s1400_s19  ;;  %p69_p2 = scmp.eq.s32.totalorder %s1416_s23, 0 }
  0x15   : > { %p74_p3 = scmp.ne.s32.totalorder %s1400_s19, %s1396_s18  ;;  %s1766_s26 = smov (%p52_p0, %s50_s26), 0 }
  0x16   : > { %1741 = sst [smem:[#allocation21_spill]] %s1766_s26  ;;  %p1499_p4 = por %p69_p2, %p68_p1 }
  0x17   : > { %p75_p5 = scmp.eq.s32.totalorder %s1487_s24, 0  ;;  %s54_s29 = ssub.s32 %s1412_s22, %s1766_s26 }
  0x18   : > { %p186_p6 = scmp.eq.s32.totalorder %s1487_s24, 1  ;;  %p59_p7 = scmp.eq.s32.totalorder %s54_s29, 0 }
  0x19   : > { %p1507_p8 = por %p75_p5, %p74_p3  ;;  %p192_p10 = scmp.eq.s32.totalorder %s1020_s25, 1 }
  0x1a   : > { %p1511_p9 = por %p186_p6, %p68_p1  ;;  %p1022_p12 = scmp.ge.s32.totalorder %s1416_s23, 2 }
  0x1b   : > { %s1516_s7 = scalar_select %p59_p7, %s1404_s20, %s61_s27  }
  0x1c   : > { %p1518_p11 = por %p192_p10, %p74_p3  ;;  %p1100_p13 = scmp.lt.s32.totalorder %s1416_s23, 2 }
  0x1d   : > { %1745 = sst [smem:[#allocation22_spill]] %s1516_s7  ;;  %s1525_s9 = sand.u32 1, %s1404_s20  }
  0x1e   : > { %s1746_s8 = scalar_select %p1518_p11, 1, 0 }
  0x1f   : > { %s1528_s10 = sshll.u32 %s1525_s9, 5  ;;  %s1064_s11 = sshll.u32 %s1412_s22, 5 }
  0x20   : > { %1747 = sst [smem:[#allocation23_spill]] %s1746_s8  ;;  %p1533_p0 = pnand %p1100_p13, %p1499_p4 }
  0x21   : > { %s267_s13 = sand.u32 1, %s1416_s23   ;;  %s1749_s1 = sld [smem:[#allocation25_spill]] }
  0x22   : > { %s271_s25 = scalar_lea.vmem [#allocation5], %s1528_s10  ;;  %s268_s29 = scalar_lea.sflag [#allocation6], %s267_s13 }
  0x23   : > { %s281_s27 = sshll.u32 %s271_s25, 4  ;;  %s1418_s28 = smov 128   ;;  %s282_s27 = int_to_ptr.vmem [resolvable:$true] %s281_s27 }
  0x24   : > { %s1419_s26 = smov 8   ;;  %p1034_p1 = scmp.ge.s32.totalorder %s1416_s23, 1 }
  0x25   : > { %p333_p2 = scmp.lt.s32.totalorder %s1416_s23, 3  ;;  %s1751_s0 = sld [smem:[#allocation24_spill]] }
  0x26   : > { %s246_s13 = scalar_lea.vmem [#allocation2], %s1528_s10  ;;  %s243_s20 = scalar_lea.sflag [#allocation3], %s1525_s9 }
  0x27   : > { %s278_s16 = scalar_lea.hbm %s1749_s1, %s1064_s11  ;;  %p1546_p3 = pnand %p1034_p1, %p333_p2 }
  0x28   : > { %s279_s17 = sshll.u32 %s278_s16, 4  ;;  %s257_s7 = sshll.u32 %s246_s13, 4  ;;  %s280_s17 = int_to_ptr.hbm [resolvable:$true] %s279_s17  ;;  %s258_s7 = int_to_ptr.vmem [resolvable:$true] %s257_s7 }
  0x29   : > { %1086 = dma.hbm_to_vmem [thread:$0]  (!%p1533_p0), %s280_s17, 512, %s282_s27, %s268_s29, %s1418_s28, %s1418_s28, %s1419_s26  }
  0x2a   : > { %s302_s23 = scalar_lea.hbm %s1724_s2, %s1064_s11  ;;  %s295_s18 = scalar_lea.vmem [#allocation7], %s1528_s10 }
  0x2b   : > { %s254_s25 = scalar_lea.hbm %s1751_s0, %s1064_s11  ;;  %s303_s8 = sshll.u32 %s302_s23, 4  ;;  %s304_s8 = int_to_ptr.hbm [resolvable:$true] %s303_s8 }
  0x2c   : > { %s255_s1 = sshll.u32 %s254_s25, 4  ;;  %s305_s15 = sshll.u32 %s295_s18, 4  ;;  %s256_s1 = int_to_ptr.hbm [resolvable:$true] %s255_s1  ;;  %s306_s15 = int_to_ptr.vmem [resolvable:$true] %s305_s15 }
  0x2d   : > { %1083 = dma.hbm_to_vmem [thread:$0]  (!%p1533_p0), %s256_s1, 512, %s258_s7, %s243_s20, %s1418_s28, %s1418_s28, %s1419_s26  }
  0x2e   : > { %1089 = dma.hbm_to_vmem [thread:$0]  (!%p1533_p0), %s304_s8, 512, %s306_s15, %s268_s29, %s1418_s28, %s1418_s28, %s1419_s26  }
  0x2f   : > { %s1032_s16 = sshll.u32 %s1525_s9, 1  ;;  %s1033_s25 = sshll.u32 %s1412_s22, 1 }
  0x30   : > { %s324_s4 = scalar_lea.hbm %s1725_s3, %s1033_s25  ;;  %s319_s1 = scalar_lea.vmem [#allocation8], %s1032_s16 }
  0x31   : > { %s328_s20 = sshll.u32 %s319_s1, 4  ;;  %s326_s7 = sshll.u32 %s324_s4, 4  ;;  %s329_s20 = int_to_ptr.vmem [resolvable:$true] %s328_s20  ;;  %s327_s7 = int_to_ptr.hbm [resolvable:$true] %s326_s7 }
  0x32   : > { %s316_s11 = scalar_lea.sflag [#allocation9], %s1525_s9  ;;  %337 = sbr.rel (%p1546_p3) target bundleno = 725 (0x2d5), region = 36 }
  0x33   : > { %1092 = dma.hbm_to_vmem [thread:$0]  (!%p1533_p0), %s327_s7, 32, %s329_s20, %s316_s11  }
  0x34   : > { %s1574_s18 = sand.u32 (!%p1546_p3), 1, %s1400_s19  }
  0x35   : > { %s1577_s23 = sshll.u32 (!%p1546_p3), %s1574_s18, 5  ;;  %s340_s0 = scalar_lea.sflag (!%p1546_p3), [#allocation3], %s1574_s18 }
  0x36   : > { %s343_s26 = scalar_lea.vmem (!%p1546_p3), [#allocation2], %s1577_s23 }
  0x37   : > { %1375 = dma.done.wait (%p1507_p8), %s340_s0, 512  }
  0x38   : > { %1377 = vsyncadd (%p1507_p8), %s340_s0, 4294966784  ;;  %s349_s4 = sand.u32 1, %s1487_s24   ;;  %s353_s9 = scalar_lea.vmem [#allocation5], %s1577_s23 }
  0x39   : > { %s350_s8 = scalar_lea.sflag [#allocation6], %s349_s4 }
  0x3a   : > { %1379 = dma.done.wait (%p1507_p8), %s350_s8, 1024  }
  0x3b   : > { %1381 = vsyncadd (%p1507_p8), %s350_s8, 4294966272  ;;  %s1038_s10 = sshll.u32 %s1574_s18, 1  ;;  %s1593_s12 = scalar_lea.vmem [#allocation7], %s1577_s23 }
  0x3c   : > { %s370_s29 = scalar_lea.sflag [#allocation9], %s1574_s18  ;;  %s373_s28 = scalar_lea.vmem [#allocation8], %s1038_s10 }
  0x3d   : > { %1383 = dma.done.wait (%p1507_p8), %s370_s29, 32  }
  0x3e   : > { %1385 = vsyncadd (%p1507_p8), %s370_s29, 4294967264  ;;  %vm439_vm0 = vcmask 261120   ;;  %v432_v0 = vld [vmem:[%s353_s9 + $0x8] sm:$0xff]  ;;  %v433_v1 = vld [vmem:[%s353_s9 + $0x10] sm:$0xff]  ;;  %v1420_v9 = vmov 0   ;;  %vm563_vm3 = vcmask 64512  }
  0x3f   : > { %v428_v2 = vld [vmem:[%s343_s26 + $0x8] sm:$0xff]  ;;  %1043 = vmatpush.xpose.msk.msra.mxu1 %vm439_vm0, %v432_v0  ;;  %1045 = vmatpush.xpose.msk.msra.mxu2 %vm439_vm0, %v433_v1  ;;  %v429_v3 = vld [vmem:[%s343_s26 + $0x10] sm:$0xff]  ;;  %v434_v4 = vld [vmem:[%s353_s9 + $0x18] sm:$0xff]  ;;  %s1643_s24 = scalar_lea.vmem [#allocation11], %s1577_s23  ;;  %s1421_s30 = smov 32  }
  0x40   : > { %v431_v5 = vld [vmem:[%s353_s9] sm:$0xff]  ;;  %1047 = vmatpush.xpose.msk.msra.mxu3 %vm439_vm0, %v434_v4  ;;  %v430_v6 = vld [vmem:[%s343_s26 + $0x18] sm:$0xff]  ;;  %v436_v53 = vld [vmem:[%s1593_s12 + $0x8] sm:$0xff]  ;;  %s1039_s14 = sshll.u32 %s1574_s18, 3  ;;  %s1067_s17 = sshll.u32 %s1408_s21, 5 }
  0x41   : > { %1041 = vmatpush.xpose.msk.msra.mxu0 %vm439_vm0, %v431_v5  ;;  %v427_v7 = vld [vmem:[%s343_s26] sm:$0xff]  ;;  %v437_v54 = vld [vmem:[%s1593_s12 + $0x10] sm:$0xff]  ;;  %v438_v56 = vld [vmem:[%s1593_s12 + $0x18] sm:$0xff]  ;;  %s815_s16 = scalar_lea.hbm %s1727_s5, %s1067_s17  ;;  %s1664_s25 = scalar_lea.vmem [#allocation10], %s1039_s14 }
  0x42   : > { %1044 = vmatmul.msk.f32.vlgmr.msra.gmra.mxu1 %vm439_vm0, %v428_v2  ;;  %1046 = vmatmul.msk.f32.vlgmr.msra.gmra.mxu2 %vm439_vm0, %v429_v3  ;;  %v548_v8 = vld [vmem:[%s373_s28] sm:$0x3]  ;;  %s816_s13 = sshll.u32 %s1643_s24, 4  ;;  %s818_s1 = sshll.u32 %s815_s16, 4  ;;  %s817_s13 = int_to_ptr.vmem [resolvable:$true] %s816_s13  ;;  %s819_s1 = int_to_ptr.hbm [resolvable:$true] %s818_s1 }
  0x43   : > { %1048 = vmatmul.msk.f32.vlgmr.msra.gmra.mxu3 %vm439_vm0, %v430_v6  ;;  %vm549_vm1 = vnez %v548_v8  ;;  %705 = vmatpush.msrb.mxu1 %v436_v53  ;;  %v435_v55 = vld [vmem:[%s1593_s12] sm:$0xff]  ;;  %s1422_s20 = smov 64   ;;  %s785_s7 = scalar_lea.sflag [#allocation12], %s1574_s18 }
  0x44   : > { %1042 = vmatmul.msk.f32.vlgmr.msra.gmra.mxu0 %vm439_vm0, %v427_v7  ;;  %v554_v10 = vsel %vm549_vm1, 16843009, %v1420_v9  ;;  %728 = vmatpush.msrb.mxu2 %v437_v54  ;;  %s1308_s11 = sshra.s32 %s819_s1, 4  ;;  %s1314_s4 = scalar_lea.hbm %s1727_s5, 64  ;;  %s1309_s11 = int_to_ptr.hbm [resolvable:$true] %s1308_s11 }
  0x45   : > { %v555_v11 = vunpack.c.0.s8 %v554_v10  ;;  %682 = vmatpush.msrb.mxu0 %v435_v55  ;;  %751 = vmatpush.msrb.mxu3 %v438_v56  ;;  %s1310_s23 = scalar_lea.hbm %s1309_s11, 32  ;;  %p1315_p7 = scmp.lt.s32.totalorder %s1309_s11, %s1727_s5 }
  0x46   : > { %p1311_p4 = scmp.ne.s32.totalorder %s1309_s11, %s1310_s23  ;;  %p1316_p8 = scmp.lt.s32.totalorder %s1314_s4, %s1310_s23 }
  0x47   : > { %vm1608_vm2 = vcmp.ne.s32.totalorder %v555_v11, 0 }
  0x48   : > { %p1312_p5 = pnand %p1311_p4, %p1511_p9  ;;  %p1317_p10 = por %p1316_p8, %p1315_p7 }
  0x4a   : > { %p1313_p6 = pneg %p1312_p5 }
  0x4c   : > { %p1318_p13 = pnand %p1317_p10, %p1313_p6 }
  0xbf   : > { %v489_v12 = vpop.f32.mrf.mxu1 }
  0xc0   : > { %v545_v13 = vmul.f32 0.17677669, %v489_v12 }
  0xc1   : > { %v463_v14 = vpop.f32.mrf.mxu0 }
  0xc2   : > { %v544_v16 = vmul.f32 0.17677669, %v463_v14  ;;  %v1050_v17 = vadd.f32 -1e+09, %v545_v13 }
  0xc4   : > { %v560_v18 = vsel %vm1608_vm2, %v545_v13, %v1050_v17  ;;  %v1049_v19 = vadd.f32 -1e+09, %v544_v16 }
  0xc5   : > { %v515_v20 = vpop.f32.mrf.mxu2  ;;  %v567_v21 = vsel %vm563_vm3, %v560_v18, -inf }
  0xc6   : > { %v546_v22 = vmul.f32 0.17677669, %v515_v20  ;;  %568 = vmax.xlane.f32.xlu1 %v567_v21  ;;  %v541_v23 = vpop.f32.mrf.mxu3  ;;  %v559_v26 = vsel %vm1608_vm2, %v544_v16, %v1049_v19 }
  0xc7   : > { %v547_v25 = vmul.f32 0.17677669, %v541_v23  ;;  %v564_v29 = vsel %vm563_vm3, %v559_v26, -inf }
  0xc8   : > { %v1051_v24 = vadd.f32 -1e+09, %v546_v22 }
  0xc9   : > { %v1052_v30 = vadd.f32 -1e+09, %v547_v25 }
  0xca   : > { %v561_v27 = vsel %vm1608_vm2, %v546_v22, %v1051_v24 }
  0xcb   : > { %v570_v28 = vsel %vm563_vm3, %v561_v27, -inf  ;;  %v562_v31 = vsel %vm1608_vm2, %v547_v25, %v1052_v30 }
  0xcc   : > { %571 = vmax.xlane.f32.xlu0 %v570_v28  ;;  %v573_v32 = vsel %vm563_vm3, %v562_v31, -inf }
  0xce   : > { %565 = vmax.xlane.f32.xlu1 %v564_v29 }
  0xd4   : > { %574 = vmax.xlane.f32.xlu0 %v573_v32 }
 0x139   : > { %v569_v33 = vpop.xlane.xlu1 %568 }
 0x13a   : > { %v577_v34 = vsub.f32 %v560_v18, %v569_v33 }
 0x13c   : > { %v582_v35 = vmul.f32 1.442695, %v577_v34 }
 0x13e   : > { %1158 = vpow2.f32 %v582_v35 }
 0x13f   : > { %v572_v36 = vpop.xlane.xlu0 %571 }
 0x140   : > { %v578_v37 = vsub.f32 %v561_v27, %v572_v36 }
 0x141   : > { %v566_v38 = vpop.xlane.xlu1 %565 }
 0x142   : > { %v584_v39 = vmul.f32 1.442695, %v578_v37  ;;  %v576_v40 = vsub.f32 %v559_v26, %v566_v38 }
 0x144   : > { %v1159_v41 = vpop.eup %1158  ;;  %1160 = vpow2.f32 %v584_v39  ;;  %v580_v42 = vmul.f32 1.442695, %v576_v40 }
 0x145   : > { %v591_v43 = vsel %vm563_vm3, %v1159_v41, 0.0 }
 0x146   : > { %1162 = vpow2.f32 %v580_v42  ;;  %592 = vadd.xlane.f32.xlu0 %v591_v43 }
 0x147   : > { %v575_v44 = vpop.xlane.xlu0 %574 }
 0x148   : > { %v579_v45 = vsub.f32 %v562_v31, %v575_v44 }
 0x14a   : > { %v1625_v46 = vpop.eup %1160  ;;  %v586_v47 = vmul.f32 1.442695, %v579_v45 }
 0x14b   : > { %v594_v48 = vsel %vm563_vm3, %v1625_v46, 0.0 }
 0x14c   : > { %v1629_v49 = vpop.eup %1162  ;;  %1164 = vpow2.f32 %v586_v47  ;;  %595 = vadd.xlane.f32.xlu2 %v594_v48 }
 0x14d   : > { %v588_v50 = vsel %vm563_vm3, %v1629_v49, 0.0 }
 0x14e   : > { %589 = vadd.xlane.f32.xlu1 %v588_v50 }
 0x152   : > { %v1633_v51 = vpop.eup %1164 }
 0x153   : > { %v597_v52 = vsel %vm563_vm3, %v1633_v51, 0.0 }
 0x154   : > { %598 = vadd.xlane.f32.xlu2 %v597_v52 }
 0x1b9   : > { %v593_v57 = vpop.xlane.xlu0 %592 }
 0x1ba   : > { %1166 = vrcp.f32 %v593_v57  ;;  %v626_v63 = vand.u32 2147483648, %v593_v57  ;;  %v624_v1 = vand.u32 2147483647, %v593_v57  ;;  %vm620_vm5 = vweird.f32 %v593_v57 }
 0x1bc   : > { %v627_v7 = vor.u32 1.1754944e-38, %v626_v63  ;;  %vm625_vm7 = vcmp.eq.f32.partialorder %v624_v1, 8.507059e+37 }
 0x1bf   : > { %v596_v58 = vpop.xlane.xlu2 %595 }
 0x1c0   : > { %v1167_v59 = vpop.eup %1166  ;;  %1168 = vrcp.f32 %v596_v58  ;;  %v639_v11 = vand.u32 2147483647, %v596_v58  ;;  %v641_v12 = vand.u32 2147483648, %v596_v58  ;;  %vm635_vm9 = vweird.f32 %v596_v58 }
 0x1c1   : > { %v616_v60 = vmul.f32 %v1167_v59, %v593_v57  ;;  %v590_v61 = vpop.xlane.xlu1 %589  ;;  %vm621_vm4 = vweird.f32 %v1167_v59 }
 0x1c2   : > { %1170 = vrcp.f32 %v590_v61  ;;  %vm622_vm6 = vmor %vm620_vm5, %vm621_vm4  ;;  %v611_v17 = vand.u32 2147483648, %v590_v61  ;;  %v609_v20 = vand.u32 2147483647, %v590_v61  ;;  %vm640_vm12 = vcmp.eq.f32.partialorder %v639_v11, 8.507059e+37 }
 0x1c3   : > { %v617_v62 = vsub.f32 1.0, %v616_v60  ;;  %v642_v22 = vor.u32 1.1754944e-38, %v641_v12  ;;  %vm605_vm13 = vweird.f32 %v590_v61 }
 0x1c4   : > { %v612_v26 = vor.u32 1.1754944e-38, %v611_v17  ;;  %vm610_vm15 = vcmp.eq.f32.partialorder %v609_v20, 8.507059e+37 }
 0x1c5   : > { %v618_v0 = vmul.f32 %v1167_v59, %v617_v62 }
 0x1c6   : > { %v1169_v2 = vpop.eup %1168 }
 0x1c7   : > { %v619_v3 = vadd.f32 %v1167_v59, %v618_v0  ;;  %v631_v4 = vmul.f32 %v1169_v2, %v596_v58  ;;  %v599_v5 = vpop.xlane.xlu2 %598  ;;  %vm636_vm8 = vweird.f32 %v1169_v2 }
 0x1c8   : > { %v1171_v6 = vpop.eup %1170  ;;  %1172 = vrcp.f32 %v599_v5  ;;  %vm637_vm11 = vmor %vm635_vm9, %vm636_vm8  ;;  %v656_v31 = vand.u32 2147483648, %v599_v5  ;;  %v654_v34 = vand.u32 2147483647, %v599_v5  ;;  %vm650_vm2 = vweird.f32 %v599_v5 }
 0x1c9   : > { %v632_v8 = vsub.f32 1.0, %v631_v4  ;;  %v601_v9 = vmul.f32 %v1171_v6, %v590_v61  ;;  %v623_v10 = vsel %vm622_vm6, %v1167_v59, %v619_v3  ;;  %vm606_vm10 = vweird.f32 %v1171_v6 }
 0x1ca   : > { %v628_v13 = vsel %vm625_vm7, %v627_v7, %v623_v10  ;;  %vm607_vm14 = vmor %vm605_vm13, %vm606_vm10  ;;  %v657_v37 = vor.u32 1.1754944e-38, %v656_v31  ;;  %vm655_vm5 = vcmp.eq.f32.partialorder %v654_v34, 8.507059e+37 }
 0x1cb   : > { %v633_v14 = vmul.f32 %v1169_v2, %v632_v8  ;;  %v602_v15 = vsub.f32 1.0, %v601_v9  ;;  %v661_v16 = vmul.f32 %v1159_v41, %v628_v13 }
 0x1cd   : > { %v634_v18 = vadd.f32 %v1169_v2, %v633_v14  ;;  %v603_v19 = vmul.f32 %v1171_v6, %v602_v15  ;;  %1054 = vmatmul.msk.f32.vlgmr.msrb.gmra.mxu1 %vm563_vm3, %v661_v16  ;;  %776 = vst.msk [vmem:[%s1643_s24 + $0x8] sm:$0xff] %vm563_vm3, %v661_v16 }
 0x1ce   : > { %v1173_v21 = vpop.eup %1172 }
 0x1cf   : > { %v604_v23 = vadd.f32 %v1171_v6, %v603_v19  ;;  %v646_v24 = vmul.f32 %v1173_v21, %v599_v5  ;;  %v638_v25 = vsel %vm637_vm11, %v1169_v2, %v634_v18  ;;  %vm651_vm1 = vweird.f32 %v1173_v21 }
 0x1d0   : > { %v643_v27 = vsel %vm640_vm12, %v642_v22, %v638_v25  ;;  %vm652_vm4 = vmor %vm650_vm2, %vm651_vm1 }
 0x1d1   : > { %v647_v28 = vsub.f32 1.0, %v646_v24  ;;  %v662_v29 = vmul.f32 %v1625_v46, %v643_v27  ;;  %v608_v30 = vsel %vm607_vm14, %v1171_v6, %v604_v23 }
 0x1d2   : > { %v613_v32 = vsel %vm610_vm15, %v612_v26, %v608_v30 }
 0x1d3   : > { %v648_v33 = vmul.f32 %v1173_v21, %v647_v28  ;;  %1055 = vmatmul.msk.f32.vlgmr.msrb.gmra.mxu2 %vm563_vm3, %v662_v29  ;;  %777 = vst.msk [vmem:[%s1643_s24 + $0x10] sm:$0xff] %vm563_vm3, %v662_v29  ;;  %v660_v35 = vmul.f32 %v1629_v49, %v613_v32 }
 0x1d5   : > { %v649_v36 = vadd.f32 %v1173_v21, %v648_v33  ;;  %1053 = vmatmul.msk.f32.vlgmr.msrb.gmra.mxu0 %vm563_vm3, %v660_v35  ;;  %775 = vst.msk [vmem:[%s1643_s24] sm:$0xff] %vm563_vm3, %v660_v35 }
 0x1d7   : > { %v653_v38 = vsel %vm652_vm4, %v1173_v21, %v649_v36 }
 0x1d8   : > { %v658_v39 = vsel %vm655_vm5, %v657_v37, %v653_v38 }
 0x1d9   : > { %v663_v40 = vmul.f32 %v1633_v51, %v658_v39 }
 0x1db   : > { %1056 = vmatmul.msk.f32.vlgmr.msrb.gmra.mxu3 %vm563_vm3, %v663_v40  ;;  %778 = vst.msk [vmem:[%s1643_s24 + $0x18] sm:$0xff] %vm563_vm3, %v663_v40 }
 0x24a   : > { %v707_v41 = vpop.f32.mrf.mxu1 }
 0x24b   : > { %758 = vrot.lane.b32.xlu2 %v707_v41, %s1421_s30 }
 0x252   : > { %v684_v42 = vpop.f32.mrf.mxu0 }
 0x253   : > { %756 = vst.msk [vmem:[%s1664_s25] sm:$0xff] %vm439_vm0, %v684_v42 }
 0x256   : > { %v730_v43 = vpop.f32.mrf.mxu2 }
 0x257   : > { %764 = vrot.lane.b32.xlu0 %v730_v43, %s1422_s20 }
 0x258   : > { %1321 = shalt.err (!%p1318_p13)
}
 0x259   : > { %s1423_s10 = smov 128   ;;  %s1424_s12 = smov 8   ;;  %vm761_vm0 = vcmask 523520   ;;  %vm767_vm3 = vcmask 785920   ;;  %vm773_vm6 = vcmask 1048320  }
 0x25a   : > { %1077 = dma.vmem_to_hbm [thread:$0]  (%p1511_p9), %s817_s13, 512, %s819_s1, %s785_s7, %s1423_s10, %s1423_s10, %s1424_s12  }
 0x25b   : > { %s1425_s29 = smov 96   ;;  %s1059_s28 = sshll.u32 %s1408_s21, 3 }
 0x25c   : > { %s1754_s14 = sld [smem:[#allocation26_spill]]  ;;  %s799_s27 = sshll.u32 %s1664_s25, 4  ;;  %s800_s27 = int_to_ptr.vmem [resolvable:$true] %s799_s27 }
 0x25d   : > { %s780_s16 = scalar_lea.sflag [#allocation4], %s1574_s18 }
 0x25e   : > { %v753_v44 = vpop.f32.mrf.mxu3 }
 0x25f   : > { %770 = vrot.lane.b32.xlu1 %v753_v44, %s1425_s29 }
 0x262   : > { %s797_s17 = scalar_lea.hbm %s1754_s14, %s1059_s28  ;;  %s1342_s7 = scalar_lea.hbm %s1754_s14, 16 }
 0x263   : > { %s801_s15 = sshll.u32 %s797_s17, 4  ;;  %s802_s15 = int_to_ptr.hbm [resolvable:$true] %s801_s15 }
 0x264   : > { %s1336_s13 = sshra.s32 %s802_s15, 4  ;;  %s1337_s13 = int_to_ptr.hbm [resolvable:$true] %s1336_s13 }
 0x265   : > { %s1338_s1 = scalar_lea.hbm %s1337_s13, 8  ;;  %p1343_p3 = scmp.lt.s32.totalorder %s1337_s13, %s1754_s14 }
 0x266   : > { %p1339_p0 = scmp.ne.s32.totalorder %s1337_s13, %s1338_s1  ;;  %p1344_p4 = scmp.lt.s32.totalorder %s1342_s7, %s1338_s1 }
 0x268   : > { %p1340_p1 = pnand %p1339_p0, %p1511_p9  ;;  %p1345_p5 = por %p1344_p4, %p1343_p3 }
 0x26a   : > { %p1341_p2 = pneg %p1340_p1 }
 0x26c   : > { %p1346_p6 = pnand %p1345_p5, %p1341_p2 }
 0x2a5   : > { %v759_v45 = vpop.permute.xlu2 %758 }
 0x2a6   : > { %762 = vst.msk [vmem:[%s1664_s25] sm:$0xff] %vm761_vm0, %v759_v45 }
 0x2c9   : > { %v765_v46 = vpop.permute.xlu0 %764 }
 0x2ca   : > { %768 = vst.msk [vmem:[%s1664_s25] sm:$0xff] %vm767_vm3, %v765_v46 }
 0x2d1   : > { %v771_v47 = vpop.permute.xlu1 %770 }
 0x2d2   : > { %774 = vst.msk [vmem:[%s1664_s25] sm:$0xff] %vm773_vm6, %v771_v47 }
 0x2d3   : > { %1349 = shalt.err (!%p1346_p6)
}
 0x2d4   : > { %1076 = dma.vmem_to_hbm [thread:$0]  (%p1511_p9), %s800_s27, 128, %s802_s15, %s780_s16  }
 0x2d5 PF: > { %s1755_s18 = sld [smem:[#allocation18_spill]]  ;;  %p1094_p7 = pnand %p1022_p12, %p1518_p11 }
 0x2d6   : > { %s1757_s0 = sld [smem:[#allocation20_spill]] }
 0x2d7   : > { %p1095_p8 = pneg %p1094_p7 }
 0x2db   : > { %s833_s26 = sand.u32 1, %s1755_s18  }
 0x2dc   : > { %s834_s4 = scalar_lea.sflag [#allocation4], %s833_s26 }
 0x2dd   : > { %1387 = dma.done.wait (%p1095_p8), %s834_s4, 128  }
 0x2de   : > { %1389 = vsyncadd (%p1095_p8), %s834_s4, 4294967168  ;;  %s844_s8 = scalar_lea.sflag [#allocation12], %s833_s26 }
 0x2df   : > { %1391 = dma.done.wait (%p1095_p8), %s844_s8, 512  }
 0x2e0   : > { %1393 = vsyncadd (%p1095_p8), %s844_s8, 4294966784  ;;  %s31_s23 = sadd.s32 1, %s1757_s0   ;;  %s1758_s6 = sld [smem:[#allocation19_spill]] }
 0x2e1   : > { %p28_p10 = scmp.ge.s32.totalorder %s31_s23, 4   ;;  %s1759_s20 = sld [smem:[#allocation22_spill]] }
 0x2e2   : > { %s1760_s9 = sld [smem:[#allocation21_spill]]  ;;  %s1761_s18 = smov %s1400_s19 }
 0x2e3   : > { %s1763_s21 = smov %s1412_s22 }
 0x2e4   :  { %30 = sbr.rel (!%p28_p10) target bundleno = 16 (0x10), region = 135 }
 0x2e6   : > { %s1762_s19 = smov %s1758_s6 }
 0x2e8   : > { %s1764_s22 = smov %s1760_s9 }
 0x2e9   :  { %850 = vsyncpa [#allocation3], 1 }
 0x2ea   :  { %852 = vsyncpa [#allocation3 + $0x1], 1 }
 0x2eb   :  { %853 = vsyncpa [#allocation6], 1 }
 0x2ec   :  { %855 = vsyncpa [#allocation6 + $0x1], 1 }
 0x2ed   :  { %856 = vsyncpa [#allocation9], 1 }
 0x2ee   :  { %858 = vsyncpa [#allocation9 + $0x1], 1 }
 0x2ef   :  { %859 = vsyncpa [#allocation4], 1 }
 0x2f0   :  { %861 = vsyncpa [#allocation4 + $0x1], 1 }
 0x2f1   :  { %862 = vsyncpa [#allocation12], 1 }
 0x2f2   :  { %864 = vsyncpa [#allocation12 + $0x1], 1 }

</bundles_post_ra>
